<compile_context>
chip_gen: v7x
topology: tpu7x:2x2x1
jax: 0.10.0
libtpu: 0.0.40
codegen_flags: <defaults>
</compile_context>

<pallas_src>
import jax
import jax.numpy as jnp
from jax.experimental import pallas as pl
from jax.experimental.pallas import tpu as pltpu


def sales_kernel(x_ref, wb_ref, bb_ref, wha_ref, bha_ref, whb_ref, bhb_ref, out_ref):
    # base Linear + ReLU  (dropout1 = identity at inference); bf16 in, f32 acc
    h = jnp.dot(x_ref[...], wb_ref[...], preferred_element_type=jnp.float32) + bb_ref[...]
    h = jnp.maximum(h, 0.0)

    # fused first layer of all three heads: (B, 3H), one MXU issue + one ReLU
    t = jnp.dot(h.astype(wha_ref.dtype), wha_ref[...],
                preferred_element_type=jnp.float32) + bha_ref[...]
    t = jnp.maximum(t, 0.0)

    # fused block-diagonal second layer -> (B, 20)
    # column layout: [ out(0:4) | logits1/T (4:12) | logits2/T (12:20) ]
    z = jnp.dot(t.astype(whb_ref.dtype), whb_ref[...],
                preferred_element_type=jnp.float32) + bhb_ref[...]

    # Segmented safe-softmax on columns 4:12 and 12:20; columns 0:4 pass through.
    lane = jax.lax.broadcasted_iota(jnp.int32, z.shape, 1)
    seg1 = (lane >= 4) & (lane < 12)
    seg2 = (lane >= 12) & (lane < 20)    # upper bound guards against lane padding
    neg_inf = jnp.float32(-jnp.inf)

    m1 = jnp.max(jnp.where(seg1, z, neg_inf), axis=-1, keepdims=True)
    m2 = jnp.max(jnp.where(seg2, z, neg_inf), axis=-1, keepdims=True)
    # pass-through lanes subtract themselves -> exp(0) = 1 (no overflow, discarded)
    shift = jnp.where(seg1, m1, jnp.where(seg2, m2, z))
    e = jnp.exp(z - shift)

    s1 = jnp.sum(jnp.where(seg1, e, 0.0), axis=-1, keepdims=True)
    s2 = jnp.sum(jnp.where(seg2, e, 0.0), axis=-1, keepdims=True)
    inv1 = pl.reciprocal(s1)   # exact: each probability row sums to 1 (f32 rounding)
    inv2 = pl.reciprocal(s2)

    # single lane-dense (B, 20) store
    out_ref[...] = jnp.where(seg1, e * inv1, jnp.where(seg2, e * inv2, z))


def pack_params(params, temperature, hidden_dim, weight_dtype=jnp.bfloat16):
    """Host-side fusion: fold 1/T into classifier heads, fuse heads into slabs."""
    assert temperature != 0, "temperature must be non-zero"
    inv_t = jnp.float32(1.0 / temperature)
    H = hidden_dim

    # fused first layer: order must match output layout [out, c1, c2]
    w_ha = jnp.concatenate([params["w_oa"], params["w_c1a"], params["w_c2a"]], axis=1)  # (H, 3H)
    b_ha = jnp.concatenate([params["b_oa"], params["b_c1a"], params["b_c2a"]], axis=1)  # (1, 3H)

    # fused block-diagonal second layer: (3H, 20); only classifier blocks scaled by 1/T
    w_hb = jnp.zeros((3 * H, 20), jnp.float32)
    w_hb = w_hb.at[0:H, 0:4].set(params["w_ob"])
    w_hb = w_hb.at[H:2 * H, 4:12].set(params["w_c1b"] * inv_t)
    w_hb = w_hb.at[2 * H:3 * H, 12:20].set(params["w_c2b"] * inv_t)
    b_hb = jnp.concatenate(
        [params["b_ob"], params["b_c1b"] * inv_t, params["b_c2b"] * inv_t], axis=1)  # (1, 20)

    # weights in bf16 (MXU operands), biases in f32 (added to the f32 accumulator)
    return {
        "w_base": params["w_base"].astype(weight_dtype),
        "b_base": params["b_base"].astype(jnp.float32),
        "w_ha": w_ha.astype(weight_dtype), "b_ha": b_ha.astype(jnp.float32),
        "w_hb": w_hb.astype(weight_dtype), "b_hb": b_hb.astype(jnp.float32),
    }


def _round_up(n, m):
    return ((n + m - 1) // m) * m


def _tile_policy():
    """(batch-tile cap, prefer >=2 grid steps) tuned per TPU generation."""
    try:
        kind = jax.devices()[0].device_kind.lower()
    except Exception:
        kind = ""
    if "v5 lite" in kind or "v5lite" in kind or "v5e" in kind:
        return 1024, False     # ~0.8 TB/s HBM: 0.3-0.5 MB/step already saturates
    if "v7" in kind or "7x" in kind:
        return 4096, True      # ~3.2 TB/s HBM, 2 TCs, only 64 MiB VMEM
    return 2048, False         # v6e / unknown default


def _choose_block_b(B, cap, prefer_two_steps):
    b8 = _round_up(max(B, 8), 8)            # sublane alignment
    if b8 <= cap:
        if prefer_two_steps and b8 >= 1024:
            # split large single-block batches so both TensorCores get work
            return _round_up(pl.cdiv(b8, 2), 8)
        return b8
    return cap


def sales_prediction_forward(x, packed):
    B, in_dim = x.shape
    H3 = packed["w_ha"].shape[1]
    H = H3 // 3

    cap, prefer_two = _tile_policy()
    block_b = _choose_block_b(B, cap, prefer_two)
    B_pad = _round_up(B, block_b)
    if B_pad != B:
        # rows are independent; zero-padded rows are computed and discarded
        x = jnp.pad(x, ((0, B_pad - B), (0, 0)))
    x = x.astype(packed["w_base"].dtype)     # bf16 input stream (f32 acc in kernel)
    grid = (B_pad // block_b,)

    # VMEM budget against the PADDED footprint: every (block_b, 32/96/20) buffer
    # pads its lane dim to 128, i.e. ~block_b*128*4 B per f32 temp.  ~6 KB/row
    # covers x/out double-buffers plus the h/t/z/e/shift temporaries with margin.
    vmem_bytes = int(min(48 * 2**20, max(32 * 2**20, 6144 * block_b)))

    def const_spec(shape):
        kwargs = {}
        if hasattr(pl, "Buffered"):
            kwargs["pipeline_mode"] = pl.Buffered(1)   # resident params: no double-buffer
        try:
            return pl.BlockSpec(shape, lambda i: (0, 0), **kwargs)
        except TypeError:                               # older BlockSpec signature
            return pl.BlockSpec(shape, lambda i: (0, 0))

    out = pl.pallas_call(
        sales_kernel,
        out_shape=jax.ShapeDtypeStruct((B_pad, 20), jnp.float32),
        grid=grid,
        in_specs=[
            pl.BlockSpec((block_b, in_dim), lambda i: (i, 0)),   # x: tiled over batch
            const_spec((in_dim, H)),                             # w_base (resident)
            const_spec((1, H)),                                  # b_base
            const_spec((H, H3)),                                 # fused head layer-1 W
            const_spec((1, H3)),                                 # fused head layer-1 b
            const_spec((H3, 20)),                                # block-diag layer-2 W
            const_spec((1, 20)),                                 # fused layer-2 b
        ],
        out_specs=pl.BlockSpec((block_b, 20), lambda i: (i, 0)),
        compiler_params=pltpu.CompilerParams(
            dimension_semantics=("parallel",),
            vmem_limit_bytes=vmem_bytes),
    )(x, packed["w_base"], packed["b_base"],
      packed["w_ha"], packed["b_ha"], packed["w_hb"], packed["b_hb"])

    return out[:B]


def init_params(key, tabular_input_dim, llm_input_dim, hidden_dim):
    """Deterministic synthetic parameters. Weights stored as (in_dim, out_dim)."""
    in_dim = tabular_input_dim + llm_input_dim
    shapes = {
        "w_base": (in_dim, hidden_dim), "b_base": (1, hidden_dim),
        "w_c1a": (hidden_dim, hidden_dim), "b_c1a": (1, hidden_dim),
        "w_c1b": (hidden_dim, 8), "b_c1b": (1, 8),
        "w_c2a": (hidden_dim, hidden_dim), "b_c2a": (1, hidden_dim),
        "w_c2b": (hidden_dim, 8), "b_c2b": (1, 8),
        "w_oa": (hidden_dim, hidden_dim), "b_oa": (1, hidden_dim),
        "w_ob": (hidden_dim, 4), "b_ob": (1, 4),
    }
    params = {}
    keys = jax.random.split(key, len(shapes))
    for k, (name, shp) in zip(keys, sorted(shapes.items())):
        fan_in = shp[0] if shp[0] > 1 else shp[1]
        params[name] = (jax.random.normal(k, shp, dtype=jnp.float32)
                        * (1.0 / jnp.sqrt(jnp.float32(fan_in))))
    return params


def reference_forward(x, params, temperature):
    """Pure-JAX f32 reference mirroring the PyTorch module exactly (unfused)."""
    h = jnp.maximum(x @ params["w_base"] + params["b_base"], 0.0)

    def head(wa, ba, wb, bb):
        t = jnp.maximum(h @ wa + ba, 0.0)
        return t @ wb + bb

    l1 = head(params["w_c1a"], params["b_c1a"], params["w_c1b"], params["b_c1b"]) / temperature
    l2 = head(params["w_c2a"], params["b_c2a"], params["w_c2b"], params["b_c2b"]) / temperature
    p1 = jax.nn.softmax(l1 - l1.max(axis=1, keepdims=True), axis=1)
    p2 = jax.nn.softmax(l2 - l2.max(axis=1, keepdims=True), axis=1)
    out = head(params["w_oa"], params["b_oa"], params["w_ob"], params["b_ob"])
    return jnp.concatenate([out, p1, p2], axis=1)


if __name__ == "__main__":
    tabular_input_dim = 16
    llm_input_dim = 16
    hidden_dim = 32
    temperature = 500.0
    B = 8

    key = jax.random.PRNGKey(0)
    kx, kp = jax.random.split(key)
    x = jax.random.normal(kx, (B, tabular_input_dim + llm_input_dim), dtype=jnp.float32)
    params = init_params(kp, tabular_input_dim, llm_input_dim, hidden_dim)

    packed = pack_params(params, temperature, hidden_dim)
    y = sales_prediction_forward(x, packed)
    y = jax.block_until_ready(y)

    y_ref = reference_forward(x, params, temperature)
    assert y.shape == (B, 20)
    # bf16 matmul operands (f32 accumulation) -> tolerance at bf16 rounding level;
    # the softmax columns are far tighter than this.
    max_err = float(jnp.max(jnp.abs(y - y_ref)))
    assert jnp.allclose(y, y_ref, atol=5e-2, rtol=5e-2), (
        f"mismatch vs reference: max abs err = {max_err}")

    print("KERNEL_OK")
</pallas_src>

<mosaic_0001>
module attributes {stable_mosaic.version = 11 : i64} {
  func.func @sales_kernel(%arg0: i32, %arg1: memref<8x32xbf16, #tpu.memory_space<vmem>>, %arg2: memref<32x32xbf16, #tpu.memory_space<vmem>>, %arg3: memref<1x32xf32, #tpu.memory_space<vmem>>, %arg4: memref<32x96xbf16, #tpu.memory_space<vmem>>, %arg5: memref<1x96xf32, #tpu.memory_space<vmem>>, %arg6: memref<96x20xbf16, #tpu.memory_space<vmem>>, %arg7: memref<1x20xf32, #tpu.memory_space<vmem>>, %arg8: memref<8x20xf32, #tpu.memory_space<vmem>>) attributes {dimension_semantics = [#tpu.dimension_semantics<parallel>], iteration_bounds = array<i64: 1>, scalar_prefetch = 0 : i64, scratch_operands = 0 : i64, tpu.core_type = #tpu.core_type<tc>, window_params = [{transform_indices = @transform_0, window_bounds = array<i64: 8, 32>}, {pipeline_mode = #tpu.pipeline_mode<synchronous>, transform_indices = @transform_1, window_bounds = array<i64: 32, 32>}, {pipeline_mode = #tpu.pipeline_mode<synchronous>, transform_indices = @transform_2, window_bounds = array<i64: 1, 32>}, {pipeline_mode = #tpu.pipeline_mode<synchronous>, transform_indices = @transform_3, window_bounds = array<i64: 32, 96>}, {pipeline_mode = #tpu.pipeline_mode<synchronous>, transform_indices = @transform_4, window_bounds = array<i64: 1, 96>}, {pipeline_mode = #tpu.pipeline_mode<synchronous>, transform_indices = @transform_5, window_bounds = array<i64: 96, 20>}, {pipeline_mode = #tpu.pipeline_mode<synchronous>, transform_indices = @transform_6, window_bounds = array<i64: 1, 20>}, {transform_indices = @transform_7, window_bounds = array<i64: 8, 20>}]} {
    %c0 = arith.constant 0 : index
    %c0_0 = arith.constant 0 : index
    %0 = vector.load %arg1[%c0, %c0_0] : memref<8x32xbf16, #tpu.memory_space<vmem>>, vector<8x32xbf16>
    %c0_1 = arith.constant 0 : index
    %c0_2 = arith.constant 0 : index
    %1 = vector.load %arg2[%c0_1, %c0_2] : memref<32x32xbf16, #tpu.memory_space<vmem>>, vector<32x32xbf16>
    %cst = arith.constant dense<0.000000e+00> : vector<8x32xf32>
    %2 = tpu.matmul %0, %1, %cst {dimension_numbers = #tpu.dot_dimension_numbers<[1], [0], [0], [1], [0, 0, 1, 1], [], []>} : vector<8x32xbf16>, vector<32x32xbf16>, vector<8x32xf32> -> vector<8x32xf32>
    %c0_3 = arith.constant 0 : index
    %c0_4 = arith.constant 0 : index
    %3 = vector.load %arg3[%c0_3, %c0_4] : memref<1x32xf32, #tpu.memory_space<vmem>>, vector<1x32xf32>
    %4 = vector.broadcast %3 : vector<1x32xf32> to vector<8x32xf32>
    %5 = arith.addf %2, %4 : vector<8x32xf32>
    %cst_5 = arith.constant 0.000000e+00 : f32
    %6 = vector.broadcast %cst_5 : f32 to vector<8x32xf32>
    %7 = arith.maximumf %5, %6 : vector<8x32xf32>
    %8 = arith.truncf %7 : vector<8x32xf32> to vector<8x32xbf16>
    %c0_6 = arith.constant 0 : index
    %c0_7 = arith.constant 0 : index
    %9 = vector.load %arg4[%c0_6, %c0_7] : memref<32x96xbf16, #tpu.memory_space<vmem>>, vector<32x96xbf16>
    %cst_8 = arith.constant dense<0.000000e+00> : vector<8x96xf32>
    %10 = tpu.matmul %8, %9, %cst_8 {dimension_numbers = #tpu.dot_dimension_numbers<[1], [0], [0], [1], [0, 0, 1, 1], [], []>} : vector<8x32xbf16>, vector<32x96xbf16>, vector<8x96xf32> -> vector<8x96xf32>
    %c0_9 = arith.constant 0 : index
    %c0_10 = arith.constant 0 : index
    %11 = vector.load %arg5[%c0_9, %c0_10] : memref<1x96xf32, #tpu.memory_space<vmem>>, vector<1x96xf32>
    %12 = vector.broadcast %11 : vector<1x96xf32> to vector<8x96xf32>
    %13 = arith.addf %10, %12 : vector<8x96xf32>
    %cst_11 = arith.constant 0.000000e+00 : f32
    %14 = vector.broadcast %cst_11 : f32 to vector<8x96xf32>
    %15 = arith.maximumf %13, %14 : vector<8x96xf32>
    %16 = arith.truncf %15 : vector<8x96xf32> to vector<8x96xbf16>
    %c0_12 = arith.constant 0 : index
    %c0_13 = arith.constant 0 : index
    %17 = vector.load %arg6[%c0_12, %c0_13] : memref<96x20xbf16, #tpu.memory_space<vmem>>, vector<96x20xbf16>
    %cst_14 = arith.constant dense<0.000000e+00> : vector<8x20xf32>
    %18 = tpu.matmul %16, %17, %cst_14 {dimension_numbers = #tpu.dot_dimension_numbers<[1], [0], [0], [1], [0, 0, 1, 1], [], []>} : vector<8x96xbf16>, vector<96x20xbf16>, vector<8x20xf32> -> vector<8x20xf32>
    %c0_15 = arith.constant 0 : index
    %c0_16 = arith.constant 0 : index
    %19 = vector.load %arg7[%c0_15, %c0_16] : memref<1x20xf32, #tpu.memory_space<vmem>>, vector<1x20xf32>
    %20 = vector.broadcast %19 : vector<1x20xf32> to vector<8x20xf32>
    %21 = arith.addf %18, %20 : vector<8x20xf32>
    %22 = tpu.iota {dimensions = array<i32: 1>} : vector<8x20xi32>
    %c4_i32 = arith.constant 4 : i32
    %23 = vector.broadcast %c4_i32 : i32 to vector<8x20xi32>
    %24 = arith.cmpi sge, %22, %23 : vector<8x20xi32>
    %c12_i32 = arith.constant 12 : i32
    %25 = vector.broadcast %c12_i32 : i32 to vector<8x20xi32>
    %26 = arith.cmpi slt, %22, %25 : vector<8x20xi32>
    %27 = arith.andi %24, %26 : vector<8x20xi1>
    %c12_i32_17 = arith.constant 12 : i32
    %28 = vector.broadcast %c12_i32_17 : i32 to vector<8x20xi32>
    %29 = arith.cmpi sge, %22, %28 : vector<8x20xi32>
    %c20_i32 = arith.constant 20 : i32
    %30 = vector.broadcast %c20_i32 : i32 to vector<8x20xi32>
    %31 = arith.cmpi slt, %22, %30 : vector<8x20xi32>
    %32 = arith.andi %29, %31 : vector<8x20xi1>
    %cst_18 = arith.constant 0xFF800000 : f32
    %33 = vector.broadcast %cst_18 : f32 to vector<8x20xf32>
    %34 = arith.select %27, %21, %33 : vector<8x20xi1>, vector<8x20xf32>
    %cst_19 = arith.constant dense<0xFF800000> : vector<8xf32>
    %35 = vector.multi_reduction <maximumf>, %34, %cst_19 [1] : vector<8x20xf32> to vector<8xf32>
    %36 = vector.shape_cast %35 : vector<8xf32> to vector<8x1xf32>
    %cst_20 = arith.constant 0xFF800000 : f32
    %37 = vector.broadcast %cst_20 : f32 to vector<8x20xf32>
    %38 = arith.select %32, %21, %37 : vector<8x20xi1>, vector<8x20xf32>
    %cst_21 = arith.constant dense<0xFF800000> : vector<8xf32>
    %39 = vector.multi_reduction <maximumf>, %38, %cst_21 [1] : vector<8x20xf32> to vector<8xf32>
    %40 = vector.shape_cast %39 : vector<8xf32> to vector<8x1xf32>
    %41 = vector.shape_cast %40 : vector<8x1xf32> to vector<8x1xf32>
    %42 = vector.broadcast %41 : vector<8x1xf32> to vector<8x20xf32>
    %43 = arith.select %32, %42, %21 : vector<8x20xi1>, vector<8x20xf32>
    %44 = vector.shape_cast %36 : vector<8x1xf32> to vector<8x1xf32>
    %45 = vector.broadcast %44 : vector<8x1xf32> to vector<8x20xf32>
    %46 = arith.select %27, %45, %43 : vector<8x20xi1>, vector<8x20xf32>
    %47 = arith.subf %21, %46 : vector<8x20xf32>
    %48 = math.exp %47 : vector<8x20xf32>
    %cst_22 = arith.constant 0.000000e+00 : f32
    %49 = vector.broadcast %cst_22 : f32 to vector<8x20xf32>
    %50 = arith.select %27, %48, %49 : vector<8x20xi1>, vector<8x20xf32>
    %cst_23 = arith.constant dense<0.000000e+00> : vector<8xf32>
    %51 = vector.multi_reduction <add>, %50, %cst_23 [1] : vector<8x20xf32> to vector<8xf32>
    %52 = vector.shape_cast %51 : vector<8xf32> to vector<8x1xf32>
    %cst_24 = arith.constant 0.000000e+00 : f32
    %53 = vector.broadcast %cst_24 : f32 to vector<8x20xf32>
    %54 = arith.select %32, %48, %53 : vector<8x20xi1>, vector<8x20xf32>
    %cst_25 = arith.constant dense<0.000000e+00> : vector<8xf32>
    %55 = vector.multi_reduction <add>, %54, %cst_25 [1] : vector<8x20xf32> to vector<8xf32>
    %56 = vector.shape_cast %55 : vector<8xf32> to vector<8x1xf32>
    %57 = tpu.reciprocal %52 : vector<8x1xf32> -> vector<8x1xf32>
    %58 = tpu.reciprocal %56 : vector<8x1xf32> -> vector<8x1xf32>
    %59 = vector.broadcast %57 : vector<8x1xf32> to vector<8x20xf32>
    %60 = arith.mulf %48, %59 : vector<8x20xf32>
    %61 = vector.broadcast %58 : vector<8x1xf32> to vector<8x20xf32>
    %62 = arith.mulf %48, %61 : vector<8x20xf32>
    %63 = arith.select %32, %62, %21 : vector<8x20xi1>, vector<8x20xf32>
    %64 = arith.select %27, %60, %63 : vector<8x20xi1>, vector<8x20xf32>
    %c0_26 = arith.constant 0 : index
    %c0_27 = arith.constant 0 : index
    %65 = vector.load %arg8[%c0_26, %c0_27] : memref<8x20xf32, #tpu.memory_space<vmem>>, vector<8x20xf32>
    tpu.vector_store %arg8[%c0_26, %c0_27], %64 {strides = array<i32>} : memref<8x20xf32, #tpu.memory_space<vmem>>, vector<8x20xf32>,
    return
  }
  func.func @transform_0(%arg0: i32) -> (i32, i32) {
    %c0_i32 = arith.constant 0 : i32
    %c0_i32_0 = arith.constant 0 : i32
    return %arg0, %c0_i32 : i32, i32
  }
  func.func @transform_1(%arg0: i32) -> (i32, i32) {
    %c0_i32 = arith.constant 0 : i32
    %c0_i32_0 = arith.constant 0 : i32
    %c0_i32_1 = arith.constant 0 : i32
    return %c0_i32, %c0_i32_0 : i32, i32
  }
  func.func @transform_2(%arg0: i32) -> (i32, i32) {
    %c0_i32 = arith.constant 0 : i32
    %c0_i32_0 = arith.constant 0 : i32
    %c0_i32_1 = arith.constant 0 : i32
    return %c0_i32, %c0_i32_0 : i32, i32
  }
  func.func @transform_3(%arg0: i32) -> (i32, i32) {
    %c0_i32 = arith.constant 0 : i32
    %c0_i32_0 = arith.constant 0 : i32
    %c0_i32_1 = arith.constant 0 : i32
    return %c0_i32, %c0_i32_0 : i32, i32
  }
  func.func @transform_4(%arg0: i32) -> (i32, i32) {
    %c0_i32 = arith.constant 0 : i32
    %c0_i32_0 = arith.constant 0 : i32
    %c0_i32_1 = arith.constant 0 : i32
    return %c0_i32, %c0_i32_0 : i32, i32
  }
  func.func @transform_5(%arg0: i32) -> (i32, i32) {
    %c0_i32 = arith.constant 0 : i32
    %c0_i32_0 = arith.constant 0 : i32
    %c0_i32_1 = arith.constant 0 : i32
    return %c0_i32, %c0_i32_0 : i32, i32
  }
  func.func @transform_6(%arg0: i32) -> (i32, i32) {
    %c0_i32 = arith.constant 0 : i32
    %c0_i32_0 = arith.constant 0 : i32
    %c0_i32_1 = arith.constant 0 : i32
    return %c0_i32, %c0_i32_0 : i32, i32
  }
  func.func @transform_7(%arg0: i32) -> (i32, i32) {
    %c0_i32 = arith.constant 0 : i32
    %c0_i32_0 = arith.constant 0 : i32
    return %arg0, %c0_i32 : i32, i32
  }
}

</mosaic_0001>

<bundles_post_ra>
// kernel: tpu_custom_call.1
= control target key start
LH: loop header
LB: loop body
LE: loop exit
PB: predicated region body
PF: predicated region fallthrough
CT: control target
= control target key end

     0   :  { %v420_v1 = vmov 0.0   ;;  %vm421_vm0 = vmmov 0   ;;  %vm52_vm1 = vcmask 261120   ;;  %s548_s0 = inlined_call_operand.vmem [shape: bf16[8,32], index: 0, kind: input, shape index: {}]   ;;  %s549_s1 = inlined_call_operand.vmem [shape: bf16[32,32], index: 1, kind: input, shape index: {}]   ;;  %s550_s2 = inlined_call_operand.vmem [shape: f32[1,32], index: 2, kind: input, shape index: {}]   ;;  %s551_s3 = inlined_call_operand.vmem [shape: bf16[32,96], index: 3, kind: input, shape index: {}]   ;;  %s552_s4 = inlined_call_operand.vmem [shape: f32[1,96], index: 4, kind: input, shape index: {}]   ;;  %s553_s5 = inlined_call_operand.vmem [shape: bf16[96,20], index: 5, kind: input, shape index: {}]   ;;  %s554_s6 = inlined_call_operand.vmem [shape: f32[1,20], index: 6, kind: input, shape index: {}]   ;;  %s555_s7 = inlined_call_operand.hbm [shape: f32[8,20], index: 7, kind: output, shape index: {}]  }
   0x1   :  { %v380_v0 = vld [vmem:[%s549_s1] sm:$0xff]   ;;  %345 = vmatprep.subr.bf16.mxu1 %v420_v1  ;;  %361 = vmatprep.subr.bf16.mxu0 %v420_v1  ;;  %v381_v2 = vld [vmem:[%s549_s1 + $0x8] sm:$0xff]  }
   0x2   :  { %346 = vmatpush3.bf16.msra.mxu1 %v380_v0  ;;  %349 = vmatprep.mubr.msk.bf16.mxu1 %vm421_vm0, %v420_v1  ;;  %v28_v3 = vld [vmem:[%s548_s0] sm:$0xf] }
   0x3   :  { %347 = vmatprep.subr.bf16.mxu1 %v420_v1  ;;  %373 = vmatprep.mubr.msk.bf16.mxu0 %vm421_vm0, %v420_v1  ;;  %v382_v4 = vld [vmem:[%s551_s3] sm:$0xff]  }
   0x6   :  { %348 = vmatpush3.bf16.msra.mxu1 %v381_v2 }
   0x7   :  { %353 = vmatprep.subr.bf16.mxu1 %v420_v1 }
   0x8   :  { %12 = vsyncpa [#allocation3], 0  ;;  %v383_v5 = vld [vmem:[%s551_s3 + $0x8] sm:$0xff]   ;;  %v384_v6 = vld [vmem:[%s553_s5] sm:$0xff]   ;;  %vm221_vm2 = vcmask 785408   ;;  %v265_v28 = vlaneseq  ;;  %vm274_vm8 = vcmask 162816  }
   0x9   :  { %350 = vmatmul.mubr.msk.bf16.vlgmr.msra.gmra.mrb[0].mxu1 %vm52_vm1, %v28_v3  ;;  %362 = vmatpush3.bf16.msra.mxu0 %v384_v6  ;;  %v385_v7 = vld [vmem:[%s553_s5 + $0x8] sm:$0xff]   ;;  %v386_v8 = vld [vmem:[%s553_s5 + $0x10] sm:$0xff]   ;;  %v387_v9 = vld [vmem:[%s553_s5 + $0x18] sm:$0xff]  }
   0xa   :  { %354 = vmatpush3.bf16.msra.mxu1 %v382_v4  ;;  %357 = vmatprep.mubr.msk.bf16.mxu1 %vm421_vm0, %v420_v1  ;;  %v316_v10 = vld [vmem:[%s550_s2] ss:$0 sm:$0xff]  ;;  %v389_v19 = vld [vmem:[%s553_s5 + $0x28] sm:$0xff]   ;;  %v266_v29 = vand.u32 127, %v265_v28 }
   0xb   :  { %355 = vmatprep.subr.bf16.mxu1 %v420_v1  ;;  %363 = vmatprep.subr.bf16.mxu0 %v420_v1  ;;  %v388_v18 = vld [vmem:[%s553_s5 + $0x20] sm:$0xff]  }
   0xc   :  { %v320_v20 = vld [vmem:[%s552_s4] ss:$0 sm:$0xff]  ;;  %vm270_vm3 = vcmp.ge.s32.totalorder %v266_v29, 12  ;;  %vm271_vm4 = vcmp.lt.s32.totalorder %v266_v29, 20  ;;  %vm267_vm5 = vcmp.ge.s32.totalorder %v266_v29, 4  ;;  %vm268_vm6 = vcmp.lt.s32.totalorder %v266_v29, 12 }
   0xd   :  { %364 = vmatpush3.bf16.msra.mxu0 %v385_v7  ;;  %v324_v30 = vld [vmem:[%s554_s6] ss:$0 sm:$0xff]  ;;  %vm507_vm7 = vmand %vm270_vm3, %vm271_vm4  ;;  %s422_s4 = smov [#allocation2]  }
   0xe   :  { %356 = vmatpush3.bf16.msra.mxu1 %v383_v5  ;;  %365 = vmatprep.subr.bf16.mxu0 %v420_v1  ;;  %vm511_vm9 = vmand %vm267_vm5, %vm268_vm6  ;;  %s308_s6 = sshll.u32 %s422_s4, 4  ;;  %s309_s6 = int_to_ptr.vmem [resolvable:$true] %s308_s6 }
   0xf   :  { %s396_s24 = scalar_lea.vmem %s309_s6, 128  ;;  %p401_p1 = scmp.lt.s32.totalorder %s309_s6, %s309_s6 }
  0x10   :  { %p397_p0 = scmp.ne.s32.totalorder %s309_s6, %s396_s24  ;;  %p402_p2 = scmp.lt.s32.totalorder %s396_s24, %s396_s24 }
  0x11   :  { %366 = vmatpush3.bf16.msra.mxu0 %v386_v8 }
  0x12   :  { %367 = vmatprep.subr.bf16.mxu0 %v420_v1  ;;  %p403_p3 = por %p402_p2, %p401_p1 }
  0x14   :  { %p404_p4 = pnand %p403_p3, %p397_p0 }
  0x15   :  { %368 = vmatpush3.bf16.msra.mxu0 %v387_v9 }
  0x16   :  { %369 = vmatprep.subr.bf16.mxu0 %v420_v1 }
  0x19   :  { %370 = vmatpush3.bf16.msra.mxu0 %v388_v18 }
  0x1a   :  { %371 = vmatprep.subr.bf16.mxu0 %v420_v1 }
  0x1d   :  { %372 = vmatpush3.bf16.msra.mxu0 %v389_v19 }
  0xdc   :  { %v90_v11 = vpop.f32.mrb[0].mxu1 }
  0xdd   :  { %v91_v12 = vadd.f32 %v316_v10, %v90_v11  ;;  %v351_v13 = vpop.f32.mrb[1].mxu1 }
  0xde   :  { %v93_v14 = vpop.f32.mrb[2].mxu1 }
  0xdf   :  { %v96_v15 = vmax.f32 %v91_v12, 0.0  ;;  %v352_v16 = vpop.f32.mrb[3].mxu1 }
  0xe1   :  { %v97_v17 = vpack.c.bf16 %v96_v15, %v96_v15 }
  0xe3   :  { %358 = vmatmul.mubr.msk.bf16.vlgmr.msra.gmra.mrb[4].mxu1 %vm52_vm1, %v97_v17 }
 0x1b6   :  { %v158_v21 = vpop.f32.mrb[4].mxu1 }
 0x1b7   :  { %v159_v22 = vadd.f32 %v320_v20, %v158_v21  ;;  %v359_v23 = vpop.f32.mrb[5].mxu1 }
 0x1b8   :  { %v161_v24 = vpop.f32.mrb[6].mxu1 }
 0x1b9   :  { %v164_v25 = vmax.f32 %v159_v22, 0.0  ;;  %v360_v26 = vpop.f32.mrb[7].mxu1 }
 0x1bb   :  { %v165_v27 = vpack.c.bf16 %v164_v25, %v164_v25 }
 0x1bd   :  { %374 = vmatmul.mubr.msk.bf16.vlgmr.msra.gmra.mrb[0].mxu0 %vm221_vm2, %v165_v27 }
 0x290   :  { %v259_v31 = vpop.f32.mrb[0].mxu0 }
 0x291   :  { %v260_v33 = vadd.f32 %v324_v30, %v259_v31  ;;  %v375_v34 = vpop.f32.mrb[1].mxu0 }
 0x292   :  { %v262_v35 = vpop.f32.mrb[2].mxu0 }
 0x293   :  { %v376_v37 = vpop.f32.mrb[3].mxu0  ;;  %v278_v38 = vsel %vm507_vm7, %v260_v33, -inf  ;;  %v273_v40 = vsel %vm511_vm9, %v260_v33, -inf }
 0x294   :  { %v279_v39 = vsel %vm274_vm8, %v278_v38, -inf  ;;  %v275_v41 = vsel %vm274_vm8, %v273_v40, -inf }
 0x295   :  { %280 = vmax.xlane.f32.xlu0 %v279_v39 }
 0x299   :  { %276 = vmax.xlane.f32.xlu0 %v275_v41 }
 0x322   :  { %v281_v42 = vpop.xlane.xlu0 %280 }
 0x323   :  { %v282_v43 = vsel %vm507_vm7, %v281_v42, %v260_v33 }
 0x326   :  { %v277_v44 = vpop.xlane.xlu0 %276 }
 0x327   :  { %v283_v45 = vsel %vm511_vm9, %v277_v44, %v282_v43 }
 0x328   :  { %v284_v46 = vsub.f32 %v260_v33, %v283_v45 }
 0x32a   :  { %v285_v47 = vmul.f32 1.442695, %v284_v46 }
 0x32c   :  { %390 = vpow2.f32 %v285_v47 }
 0x336   :  { %v391_v48 = vpop.eup %390 }
 0x337   :  { %v291_v49 = vsel %vm507_vm7, %v391_v48, 0.0  ;;  %v287_v51 = vsel %vm511_vm9, %v391_v48, 0.0 }
 0x338   :  { %v292_v50 = vsel %vm274_vm8, %v291_v49, 0.0  ;;  %v288_v52 = vsel %vm274_vm8, %v287_v51, 0.0 }
 0x339   :  { %293 = vadd.xlane.f32.xlu1 %v292_v50 }
 0x33d   :  { %289 = vadd.xlane.f32.xlu1 %v288_v52 }
 0x3c6   :  { %v294_v53 = vpop.xlane.xlu1 %293 }
 0x3c7   :  { %392 = vrcp.f32 %v294_v53 }
 0x3ca   :  { %v290_v54 = vpop.xlane.xlu1 %289 }
 0x3cb   :  { %394 = vrcp.f32 %v290_v54 }
 0x3d1   :  { %v393_v55 = vpop.eup %392 }
 0x3d2   :  { %v298_v56 = vmul.f32 %v393_v55, %v391_v48 }
 0x3d4   :  { %v299_v59 = vsel %vm507_vm7, %v298_v56, %v260_v33 }
 0x3d5   :  { %v395_v57 = vpop.eup %394 }
 0x3d6   :  { %v297_v58 = vmul.f32 %v395_v57, %v391_v48 }
 0x3d8   :  { %v300_v60 = vsel %vm511_vm9, %v297_v58, %v299_v59 }
 0x3d9   :  { %301 = vst.msk [vmem:[#allocation2] sm:$0xff] %vm274_vm8, %v300_v60 }
 0x3da   :  { %407 = shalt.err (!%p404_p4)
}
 0x3db   :  { %s408_s27 = scalar_lea.hbm %s555_s7, 128 }
 0x3dc   :  { %p409_p5 = scmp.ne.s32.totalorder %s555_s7, %s408_s27  ;;  %p412_p6 = scmp.lt.u32.totalorder %s408_s27, %s555_s7 }
 0x3de   :  { %p414_p7 = pnand %p412_p6, %p409_p5 }
 0x3e0   :  { %417 = shalt.err (!%p414_p7)
}
 0x3e1   :  { %311 = dma.vmem_to_hbm [thread:$0]  %s309_s6, 128, %s555_s7, [#allocation3]  }
 0x3e2   :  { %418 = dma.done.wait [#allocation3], 128  }
 0x3e3   :  { %419 = vsyncadd [#allocation3], 4294967168 }
 0x3e4   :  { %315 = vsyncpa [#allocation3], 1 }

</bundles_post_ra>
